<compile_context>
chip_gen: v7x
topology: tpu7x:2x2x1
jax: 0.10.0
libtpu: 0.0.40
codegen_flags: <defaults>
</compile_context>

<pallas_src>
import jax
import jax.numpy as jnp
from jax.experimental import pallas as pl
from jax.experimental.pallas import tpu as pltpu

LANES = 128
SUBLANES = 8


def _round_up(x, m):
    return ((x + m - 1) // m) * m


def masked_sse_kernel(p_ref, l_ref, sse_ref, cnt_ref):
    """Accumulates masked sum-of-squared-error and valid-count partials.

    Grid = (splits, tiles_per_split).  The (8,128) output blocks (one per
    split) stay resident in VMEM across the inner reduction axis and act as
    accumulators; they are zeroed on the first inner step of each split.
    """
    step = pl.program_id(1)

    @pl.when(step == 0)
    def _init():
        sse_ref[...] = jnp.zeros_like(sse_ref)
        cnt_ref[...] = jnp.zeros_like(cnt_ref)

    labels = l_ref[...].astype(jnp.float32)
    preds = p_ref[...].astype(jnp.float32)

    mask = jnp.logical_not(jnp.isnan(labels))      # valid (non-finished) slots
    diff = jnp.where(mask, preds - labels, 0.0)    # zero-out NaN positions

    # Fold the (tile_rows, 128) tile down to one vreg-shaped (8, 128) partial.
    # The reshape is a natural sub-tiling (no data movement); the axis-0 sum is
    # a chain of plain vector adds that hides under the input DMA.
    r = diff.shape[0] // SUBLANES
    sse_ref[...] += jnp.sum((diff * diff).reshape(r, SUBLANES, LANES), axis=0)
    cnt_ref[...] += jnp.sum(
        mask.astype(jnp.float32).reshape(r, SUBLANES, LANES), axis=0
    )


def temporal_mse_loss(preds, labels, *, max_tile_rows=2048, num_splits=2):
    """Equivalent of TemporalLossWrapper(nn.MSELoss())(preds, labels)."""
    assert preds.shape == labels.shape
    total = preds.size

    # Lane-dense layout: rows of 128 lanes, padded so every split has an equal
    # whole number of (tile_rows, 128) tiles.
    rows = -(-total // LANES)
    rows_per_split = max(SUBLANES, _round_up(-(-rows // num_splits), SUBLANES))
    tile_rows = min(max_tile_rows, rows_per_split)           # multiple of 8
    rows_per_split = _round_up(rows_per_split, tile_rows)
    tiles_per_split = rows_per_split // tile_rows
    padded_rows = num_splits * rows_per_split
    padded_total = padded_rows * LANES

    # Keep the original (possibly narrow) dtype through HBM; widen in-kernel.
    p_flat = preds.reshape(-1)
    l_flat = labels.reshape(-1)
    pad = padded_total - total
    if pad:
        # NaN labels in the padding -> masked out (contribute 0 to sse & cnt).
        p_flat = jnp.concatenate([p_flat, jnp.zeros((pad,), p_flat.dtype)])
        l_flat = jnp.concatenate([l_flat, jnp.full((pad,), jnp.nan, l_flat.dtype)])
    p2 = p_flat.reshape(padded_rows, LANES)
    l2 = l_flat.reshape(padded_rows, LANES)

    in_map = lambda c, i: (c * tiles_per_split + i, 0)
    out_map = lambda c, i: (c, 0)

    sse_partials, cnt_partials = pl.pallas_call(
        masked_sse_kernel,
        out_shape=(
            jax.ShapeDtypeStruct((num_splits * SUBLANES, LANES), jnp.float32),
            jax.ShapeDtypeStruct((num_splits * SUBLANES, LANES), jnp.float32),
        ),
        grid_spec=pltpu.PrefetchScalarGridSpec(
            num_scalar_prefetch=0,
            grid=(num_splits, tiles_per_split),
            in_specs=[
                pl.BlockSpec((tile_rows, LANES), in_map),
                pl.BlockSpec((tile_rows, LANES), in_map),
            ],
            out_specs=[
                pl.BlockSpec((SUBLANES, LANES), out_map),
                pl.BlockSpec((SUBLANES, LANES), out_map),
            ],
        ),
        compiler_params=pltpu.CompilerParams(
            # split axis parallel (uses both TCs on v7x); reduction axis serial.
            dimension_semantics=("parallel", "arbitrary"),
        ),
    )(p2, l2)

    # Glue: tiny cross-lane reduce + MSELoss(reduction="mean") divide.
    return jnp.sum(sse_partials) / jnp.sum(cnt_partials)


def temporal_mse_loss_ref(preds, labels):
    """Pure-JAX reference matching the PyTorch semantics."""
    mask = jnp.logical_not(jnp.isnan(labels))
    diff = jnp.where(mask, preds.astype(jnp.float32) - labels.astype(jnp.float32), 0.0)
    return jnp.sum(diff * diff) / jnp.sum(mask.astype(jnp.float32))


if __name__ == "__main__":
    key = jax.random.PRNGKey(0)
    kp, kl, km = jax.random.split(key, 3)

    N, L, C = 2, 8, 32  # [batch, length, channels]
    preds = jax.random.normal(kp, (N, L, C), dtype=jnp.float32)
    labels = jax.random.normal(kl, (N, L, C), dtype=jnp.float32)

    # Mark "finished" time-series tail positions as NaN (what the wrapper masks out).
    finished = jax.random.bernoulli(km, p=0.3, shape=(N, L, 1))
    labels = jnp.where(finished, jnp.nan, labels)

    loss = temporal_mse_loss(preds, labels)
    jax.block_until_ready(loss)

    ref = temporal_mse_loss_ref(preds, labels)
    assert jnp.allclose(loss, ref, rtol=1e-5, atol=1e-6), (loss, ref)

    print("KERNEL_OK")
</pallas_src>

<mosaic_0001>
module attributes {stable_mosaic.version = 11 : i64} {
  func.func @masked_sse_kernel(%arg0: i32, %arg1: i32, %arg2: memref<8x128xf32, #tpu.memory_space<vmem>>, %arg3: memref<8x128xf32, #tpu.memory_space<vmem>>, %arg4: memref<8x128xf32, #tpu.memory_space<vmem>>, %arg5: memref<8x128xf32, #tpu.memory_space<vmem>>) attributes {dimension_semantics = [#tpu.dimension_semantics<parallel>, #tpu.dimension_semantics<arbitrary>], iteration_bounds = array<i64: 2, 1>, scalar_prefetch = 0 : i64, scratch_operands = 0 : i64, tpu.core_type = #tpu.core_type<tc>, window_params = [{transform_indices = @transform_0, window_bounds = array<i64: 8, 128>}, {transform_indices = @transform_1, window_bounds = array<i64: 8, 128>}, {transform_indices = @transform_2, window_bounds = array<i64: 8, 128>}, {transform_indices = @transform_3, window_bounds = array<i64: 8, 128>}]} {
    %c0_i32 = arith.constant 0 : i32
    %0 = arith.cmpi eq, %arg1, %c0_i32 : i32
    %1 = arith.extui %0 : i1 to i32
    %c0_i32_0 = arith.constant 0 : i32
    %2 = arith.cmpi ne, %1, %c0_i32_0 : i32
    scf.if %2 {
      %cst_15 = arith.constant 0.000000e+00 : f32
      %23 = vector.broadcast %cst_15 : f32 to vector<8x128xf32>
      %c0_16 = arith.constant 0 : index
      %c0_17 = arith.constant 0 : index
      %24 = vector.load %arg4[%c0_16, %c0_17] : memref<8x128xf32, #tpu.memory_space<vmem>>, vector<8x128xf32>
      tpu.vector_store %arg4[%c0_16, %c0_17], %23 {strides = array<i32>} : memref<8x128xf32, #tpu.memory_space<vmem>>, vector<8x128xf32>,
      %cst_18 = arith.constant 0.000000e+00 : f32
      %25 = vector.broadcast %cst_18 : f32 to vector<8x128xf32>
      %c0_19 = arith.constant 0 : index
      %c0_20 = arith.constant 0 : index
      %26 = vector.load %arg5[%c0_19, %c0_20] : memref<8x128xf32, #tpu.memory_space<vmem>>, vector<8x128xf32>
      tpu.vector_store %arg5[%c0_19, %c0_20], %25 {strides = array<i32>} : memref<8x128xf32, #tpu.memory_space<vmem>>, vector<8x128xf32>,
    } else {
    }
    %c0 = arith.constant 0 : index
    %c0_1 = arith.constant 0 : index
    %3 = vector.load %arg3[%c0, %c0_1] : memref<8x128xf32, #tpu.memory_space<vmem>>, vector<8x128xf32>
    %c0_2 = arith.constant 0 : index
    %c0_3 = arith.constant 0 : index
    %4 = vector.load %arg2[%c0_2, %c0_3] : memref<8x128xf32, #tpu.memory_space<vmem>>, vector<8x128xf32>
    %5 = arith.cmpf one, %3, %3 : vector<8x128xf32>
    %cst = arith.constant dense<true> : vector<8x128xi1>
    %6 = arith.xori %5, %cst : vector<8x128xi1>
    %7 = arith.subf %4, %3 : vector<8x128xf32>
    %cst_4 = arith.constant 0.000000e+00 : f32
    %8 = vector.broadcast %cst_4 : f32 to vector<8x128xf32>
    %9 = arith.select %6, %7, %8 : vector<8x128xi1>, vector<8x128xf32>
    %c0_5 = arith.constant 0 : index
    %c0_6 = arith.constant 0 : index
    %10 = vector.load %arg4[%c0_5, %c0_6] : memref<8x128xf32, #tpu.memory_space<vmem>>, vector<8x128xf32>
    %11 = arith.mulf %9, %9 : vector<8x128xf32>
    %12 = vector.shape_cast %11 : vector<8x128xf32> to vector<1x8x128xf32>
    %cst_7 = arith.constant dense<0.000000e+00> : vector<8x128xf32>
    %13 = vector.multi_reduction <add>, %12, %cst_7 [0] : vector<1x8x128xf32> to vector<8x128xf32>
    %14 = arith.addf %10, %13 : vector<8x128xf32>
    %c0_8 = arith.constant 0 : index
    %c0_9 = arith.constant 0 : index
    %15 = vector.load %arg4[%c0_8, %c0_9] : memref<8x128xf32, #tpu.memory_space<vmem>>, vector<8x128xf32>
    tpu.vector_store %arg4[%c0_8, %c0_9], %14 {strides = array<i32>} : memref<8x128xf32, #tpu.memory_space<vmem>>, vector<8x128xf32>,
    %c0_10 = arith.constant 0 : index
    %c0_11 = arith.constant 0 : index
    %16 = vector.load %arg5[%c0_10, %c0_11] : memref<8x128xf32, #tpu.memory_space<vmem>>, vector<8x128xf32>
    %17 = arith.extui %6 : vector<8x128xi1> to vector<8x128xi32>
    %18 = arith.sitofp %17 : vector<8x128xi32> to vector<8x128xf32>
    %19 = vector.shape_cast %18 : vector<8x128xf32> to vector<1x8x128xf32>
    %cst_12 = arith.constant dense<0.000000e+00> : vector<8x128xf32>
    %20 = vector.multi_reduction <add>, %19, %cst_12 [0] : vector<1x8x128xf32> to vector<8x128xf32>
    %21 = arith.addf %16, %20 : vector<8x128xf32>
    %c0_13 = arith.constant 0 : index
    %c0_14 = arith.constant 0 : index
    %22 = vector.load %arg5[%c0_13, %c0_14] : memref<8x128xf32, #tpu.memory_space<vmem>>, vector<8x128xf32>
    tpu.vector_store %arg5[%c0_13, %c0_14], %21 {strides = array<i32>} : memref<8x128xf32, #tpu.memory_space<vmem>>, vector<8x128xf32>,
    return
  }
  func.func @transform_0(%arg0: i32, %arg1: i32) -> (i32, i32) {
    %c1_i32 = arith.constant 1 : i32
    %0 = arith.muli %arg0, %c1_i32 : i32
    %1 = arith.addi %0, %arg1 : i32
    %c0_i32 = arith.constant 0 : i32
    %c0_i32_0 = arith.constant 0 : i32
    return %1, %c0_i32 : i32, i32
  }
  func.func @transform_1(%arg0: i32, %arg1: i32) -> (i32, i32) {
    %c1_i32 = arith.constant 1 : i32
    %0 = arith.muli %arg0, %c1_i32 : i32
    %1 = arith.addi %0, %arg1 : i32
    %c0_i32 = arith.constant 0 : i32
    %c0_i32_0 = arith.constant 0 : i32
    return %1, %c0_i32 : i32, i32
  }
  func.func @transform_2(%arg0: i32, %arg1: i32) -> (i32, i32) {
    %c0_i32 = arith.constant 0 : i32
    %c0_i32_0 = arith.constant 0 : i32
    return %arg0, %c0_i32 : i32, i32
  }
  func.func @transform_3(%arg0: i32, %arg1: i32) -> (i32, i32) {
    %c0_i32 = arith.constant 0 : i32
    %c0_i32_0 = arith.constant 0 : i32
    return %arg0, %c0_i32 : i32, i32
  }
}

</mosaic_0001>

<bundles_post_ra>
// kernel: tpu_custom_call.1
= control target key start
LH: loop header
LB: loop body
LE: loop exit
PB: predicated region body
PF: predicated region fallthrough
CT: control target
= control target key end

     0   :  { %9 = vsyncpa [#allocation3], 0  ;;  %s1003_s0 = inlined_call_operand.hbm [shape: f32[16,128], index: 0, kind: input, shape index: {}]   ;;  %s1004_s1 = inlined_call_operand.hbm [shape: f32[16,128], index: 1, kind: input, shape index: {}]   ;;  %s1005_s2 = inlined_call_operand.hbm [shape: f32[16,128], index: 2, kind: output, shape index: {0}]   ;;  %s1006_s3 = inlined_call_operand.hbm [shape: f32[16,128], index: 3, kind: output, shape index: {1}]  }
   0x1   :  { %11 = vsyncpa [#allocation3 + $0x1], 0 }
   0x2   :  { %12 = vsyncpa [#allocation6], 0 }
   0x3   :  { %14 = vsyncpa [#allocation6 + $0x1], 0 }
   0x4   :  { %15 = vsyncpa [#allocation4], 0 }
   0x5   :  { %17 = vsyncpa [#allocation4 + $0x1], 0 }
   0x6   :  { %18 = vsyncpa [#allocation9], 0 }
   0x7   :  { %20 = vsyncpa [#allocation9 + $0x1], 0  ;;  %s744_s12 = smov 0   ;;  %s746_s13 = smov 0  }
   0x8   :  { %s748_s14 = smov 0   ;;  %s750_s15 = smov 0  }
   0x9   :  { %s752_s16 = smov 0   ;;  %s754_s17 = smov 0  }
   0xa LB: > { %s444_s18 = sadd.s32 4294967295, %s716_s17   ;;  %s445_s19 = sadd.s32 4294967294, %s716_s17   ;;  %s716_s17 = sphi %s754_s17, %s26_s17   ;;  %s712_s16 = sphi %s752_s16, %s1026_s16   ;;  %s708_s15 = sphi %s750_s15, %s1025_s15   ;;  %s704_s14 = sphi %s748_s14, %s1024_s14   ;;  %s700_s13 = sphi %s746_s13, %s1023_s13   ;;  %s696_s12 = sphi %s744_s12, %s1022_s12  }
   0xb   : > { %s38_s20 = sadd.s32 1, %s712_s16  ;;  %s47_s21 = sadd.s32 1, %s704_s14 }
   0xc   : > { %p40_p0 = scmp.ge.s32.totalorder %s38_s20, 2  ;;  %p54_p1 = scmp.ne.s32.totalorder %s704_s14, %s700_s13 }
   0xd   : > { %p55_p2 = scmp.eq.s32.totalorder %s716_s17, 0  ;;  %p60_p3 = scmp.ne.s32.totalorder %s700_s13, %s696_s12 }
   0xe   : > { %s1028_s20 = smov (%p40_p0, %s38_s20), 0  ;;  %p61_p5 = scmp.eq.s32.totalorder %s444_s18, 0 }
   0xf   : > { %p785_p4 = por %p55_p2, %p54_p1  ;;  %s44_s23 = ssub.s32 %s712_s16, %s1028_s20 }
  0x10   : > { %p112_p6 = scmp.eq.s32.totalorder %s444_s18, 1  ;;  %p45_p7 = scmp.eq.s32.totalorder %s44_s23, 0 }
  0x11   : > { %p791_p8 = por %p61_p5, %p60_p3  ;;  %p118_p10 = scmp.eq.s32.totalorder %s445_s19, 1 }
  0x12   : > { %p795_p9 = por %p112_p6, %p54_p1  ;;  %p486_p13 = scmp.lt.s32.totalorder %s716_s17, 2 }
  0x13   : > { %s1010_s24 = scalar_select %p791_p8, 1, 0 }
  0x14   : > { %s1011_s25 = scalar_select %p795_p9, 1, 0 }
  0x15   : > { %s800_s26 = scalar_select %p45_p7, %s704_s14, %s47_s21  }
  0x16   : > { %p802_p11 = por %p118_p10, %p60_p3  ;;  %s809_s28 = sand.u32 1, %s704_s14  }
  0x17   : > { %s448_s29 = sshll.u32 %s809_s28, 3  ;;  %s449_s30 = sshll.u32 %s712_s16, 7 }
  0x18   : > { %s1012_s27 = scalar_select %p802_p11, 1, 0 }
  0x19   : > { %s818_s6 = scalar_lea.hbm %s1003_s0, %s449_s30  ;;  %s168_s7 = scalar_lea.vmem [#allocation2], %s448_s29 }
  0x1a   : > { %s176_s8 = sshll.u32 %s168_s7, 4  ;;  %p826_p0 = pnand %p486_p13, %p785_p4  ;;  %s822_s8 = int_to_ptr.vmem [resolvable:$true] %s176_s8 }
  0x1b   : > { %s165_s10 = scalar_lea.sflag [#allocation3], %s809_s28  ;;  %s538_s11 = scalar_lea.hbm %s818_s6, 128 }
  0x1c   : > { %p539_p3 = scmp.ne.s32.totalorder %s818_s6, %s538_s11  ;;  %p540_p5 = pneg %p826_p0 }
  0x1d   : > { %s543_s21 = scalar_lea.hbm %s1003_s0, 256  ;;  %p544_p4 = scmp.lt.u32.totalorder %s818_s6, %s1003_s0 }
  0x1e   : > { %p541_p6 = pnand %p540_p5, %p539_p3  ;;  %p545_p10 = scmp.lt.u32.totalorder %s543_s21, %s538_s11 }
  0x1f   : > { %p547_p12 = scmp.lt.u32.totalorder %s538_s11, %s818_s6 }
  0x20   : > { %p542_p7 = pneg %p541_p6  ;;  %p546_p13 = por %p545_p10, %p544_p4 }
  0x22   : > { %p548_p1 = por %p547_p12, %p546_p13 }
  0x24   : > { %p549_p2 = pnand %p548_p1, %p542_p7 }
  0x26   : > { %552 = shalt.err (!%p549_p2)
}
  0x27   : > { %s553_s4 = scalar_lea.vmem %s822_s8, 128  ;;  %s718_s5 = smov [#allocation2]  }
  0x28   : > { %p554_p3 = scmp.ne.s32.totalorder %s822_s8, %s553_s4  ;;  %s558_s7 = sshll.u32 %s718_s5, 4  ;;  %s559_s7 = int_to_ptr.vmem [resolvable:$false] %s558_s7 }
  0x29   : > { %s560_s18 = scalar_lea.vmem %s559_s7, 256  ;;  %p561_p9 = scmp.lt.s32.totalorder %s822_s8, %s559_s7 }
  0x2a   : > { %p556_p6 = pnand %p554_p3, %p540_p5  ;;  %p562_p4 = scmp.lt.s32.totalorder %s560_s18, %s553_s4 }
  0x2c   : > { %p557_p11 = pneg %p556_p6  ;;  %p563_p10 = por %p562_p4, %p561_p9 }
  0x2e   : > { %p564_p12 = pnand %p563_p10, %p557_p11 }
  0x30   : > { %567 = shalt.err (!%p564_p12)
}
  0x31   : > { %475 = dma.hbm_to_vmem [thread:$0]  (!%p826_p0), %s818_s6, 128, %s822_s8, %s165_s10  }
  0x32   : > { %p1014_p1 = scmp.lt.s32.totalorder %s716_s17, 3  ;;  %p1015_p2 = scmp.ge.s32.totalorder %s716_s17, 1 }
  0x33   : > { %s871_s22 = scalar_lea.hbm %s1004_s1, %s449_s30  ;;  %s187_s23 = scalar_lea.vmem [#allocation5], %s448_s29 }
  0x34   : > { %p862_p7 = pnand %p1015_p2, %p1014_p1  ;;  %s195_s4 = sshll.u32 %s187_s23, 4  ;;  %s196_s4 = int_to_ptr.vmem [resolvable:$true] %s195_s4 }
  0x35   : > { %s184_s6 = scalar_lea.sflag [#allocation6], %s809_s28  ;;  %s568_s8 = scalar_lea.hbm %s871_s22, 128 }
  0x36   : > { %s1016_s11 = scalar_select %p862_p7, 1, 0 }
  0x37   : > { %p569_p9 = scmp.ne.s32.totalorder %s871_s22, %s568_s8  ;;  %s573_s30 = scalar_lea.hbm %s1004_s1, 256 }
  0x38   : > { %p574_p3 = scmp.lt.u32.totalorder %s871_s22, %s1004_s1  ;;  %p575_p6 = scmp.lt.u32.totalorder %s573_s30, %s568_s8 }
  0x39   : > { %p571_p11 = pnand %p569_p9, %p540_p5  ;;  %p577_p10 = scmp.lt.u32.totalorder %s568_s8, %s871_s22 }
  0x3a   : > { %p576_p4 = por %p575_p6, %p574_p3 }
  0x3b   : > { %p572_p13 = pneg %p571_p11 }
  0x3c   : > { %p578_p12 = por %p577_p10, %p576_p4 }
  0x3e   : > { %p579_p1 = pnand %p578_p12, %p572_p13 }
  0x40   : > { %582 = shalt.err (!%p579_p1)
}
  0x41   : > { %s583_s28 = scalar_lea.vmem %s196_s4, 128  ;;  %s719_s29 = smov [#allocation5]  }
  0x42   : > { %p584_p2 = scmp.ne.s32.totalorder %s196_s4, %s583_s28  ;;  %s588_s19 = sshll.u32 %s719_s29, 4  ;;  %s589_s19 = int_to_ptr.vmem [resolvable:$false] %s588_s19 }
  0x43   : > { %s590_s21 = scalar_lea.vmem %s589_s19, 256  ;;  %p591_p8 = scmp.lt.s32.totalorder %s196_s4, %s589_s19 }
  0x44   : > { %p586_p9 = pnand %p584_p2, %p540_p5  ;;  %p592_p7 = scmp.lt.s32.totalorder %s590_s21, %s583_s28 }
  0x46   : > { %p587_p11 = pneg %p586_p9  ;;  %p593_p3 = por %p592_p7, %p591_p8 }
  0x48   : > { %p594_p6 = pnand %p593_p3, %p587_p11 }
  0x4a   : > { %597 = shalt.err (!%p594_p6)
}
  0x4b   : > { %478 = dma.hbm_to_vmem [thread:$0]  (!%p826_p0), %s871_s22, 128, %s196_s4, %s184_s6  }
  0x4c   : > { %p1017_p13 = scmp.ne.s32.totalorder %s1016_s11, 0 }
  0x4d   : > { %s898_s23 = sand.u32 (!%p1017_p13), 1, %s700_s13   ;;  %p1018_p8 = scmp.ne.s32.totalorder (!%p1017_p13), %s1010_s24, 0 }
  0x4e   : > { %204 = sbr.rel (%p1017_p13) target bundleno = 138 (0x8a), region = 28  ;;  %s901_s8 = sshll.u32 (!%p1017_p13), %s898_s23, 3 }
  0x4f   : > { %s207_s10 = scalar_lea.sflag (!%p1017_p13), [#allocation3], %s898_s23  ;;  %s210_s5 = scalar_lea.vmem (!%p1017_p13), [#allocation2], %s901_s8 }
  0x55   : > { %679 = dma.done.wait (%p1018_p8), %s207_s10, 128  }
  0x56   : > { %681 = vsyncadd (%p1018_p8), %s207_s10, 4294967168  ;;  %s216_s9 = scalar_lea.sflag [#allocation6], %s898_s23  ;;  %s219_s11 = scalar_lea.vmem [#allocation5], %s901_s8 }
  0x57   : > { %683 = dma.done.wait (%p1018_p8), %s216_s9, 128  }
  0x58   : > { %685 = vsyncadd (%p1018_p8), %s216_s9, 4294967168  ;;  %v260_v0 = vld [vmem:[%s219_s11] sm:$0xff]  ;;  %v261_v1 = vld [vmem:[%s210_s5] sm:$0xff]  ;;  %s460_s22 = sshll.u32 %s708_s15, 7  ;;  %s251_s4 = scalar_lea.vmem [#allocation8], %s901_s8  ;;  %vm720_vm1 = vmmov 1  }
  0x59   : > { %vm262_vm0 = vcmp.ne.f32.partialorder %v260_v0, %v260_v0  ;;  %v264_v2 = vsub.f32 %v261_v1, %v260_v0  ;;  %s309_s6 = sshll.u32 %s251_s4, 4  ;;  %v721_v4 = vmov 0.0   ;;  %s244_s24 = scalar_lea.vmem [#allocation7], %s901_s8  ;;  %s925_s6 = int_to_ptr.vmem [resolvable:$true] %s309_s6 }
  0x5a   : > { %vm263_vm2 = vmxor %vm262_vm0, %vm720_vm1  ;;  %s296_s30 = sshll.u32 %s244_s24, 4  ;;  %s923_s28 = scalar_lea.hbm %s1006_s3, %s460_s22  ;;  %s932_s30 = int_to_ptr.vmem [resolvable:$true] %s296_s30 }
  0x5b   : > { %v265_v3 = vsel %vm263_vm2, %v264_v2, 0.0  ;;  %v457_v5 = vsel %vm263_vm2, 1.0, %v721_v4  ;;  %s930_s19 = scalar_lea.hbm %s1005_s2, %s460_s22  ;;  %s283_s21 = scalar_lea.sflag [#allocation9], %s898_s23 }
  0x5c   : > { %v267_v6 = vmul.f32 %v265_v3, %v265_v3  ;;  %276 = vst [vmem:[%s251_s4] sm:$0xff] %v457_v5  ;;  %s598_s10 = scalar_lea.vmem %s925_s6, 128  ;;  %p1019_p5 = scmp.ne.s32.totalorder %s1011_s25, 0 }
  0x5d   : > { %p599_p0 = scmp.ne.s32.totalorder %s925_s6, %s598_s10  ;;  %s722_s5 = smov [#allocation8]  }
  0x5e   : > { %s602_s9 = sshll.u32 %s722_s5, 4  ;;  %s603_s9 = int_to_ptr.vmem [resolvable:$false] %s602_s9 }
  0x5f   : > { %p600_p7 = pnand %p599_p0, %p1019_p5  ;;  %s604_s11 = scalar_lea.vmem %s603_s9, 256 }
  0x60   : > { %p605_p10 = scmp.lt.s32.totalorder %s925_s6, %s603_s9  ;;  %p606_p12 = scmp.lt.s32.totalorder %s604_s11, %s598_s10 }
  0x61   : > { %p601_p4 = pneg %p600_p7 }
  0x62   : > { %p607_p1 = por %p606_p12, %p605_p10 }
  0x64   : > { %p608_p2 = pnand %p607_p1, %p601_p4 }
  0x66   : > { %611 = shalt.err (!%p608_p2)
}
  0x67   : > { %s612_s22 = scalar_lea.hbm %s923_s28, 128  ;;  %s616_s18 = scalar_lea.hbm %s1006_s3, 256 }
  0x68   : > { %p613_p9 = scmp.ne.s32.totalorder %s923_s28, %s612_s22  ;;  %p617_p6 = scmp.lt.u32.totalorder %s923_s28, %s1006_s3 }
  0x69   : > { %p618_p13 = scmp.lt.u32.totalorder %s616_s18, %s612_s22  ;;  %p620_p0 = scmp.lt.u32.totalorder %s612_s22, %s923_s28 }
  0x6a   : > { %p614_p11 = pnand %p613_p9, %p1019_p5 }
  0x6b   : > { %p619_p8 = por %p618_p13, %p617_p6 }
  0x6c   : > { %p615_p3 = pneg %p614_p11 }
  0x6d   : > { %p621_p7 = por %p620_p0, %p619_p8 }
  0x6f   : > { %p622_p4 = pnand %p621_p7, %p615_p3 }
  0x71   : > { %625 = shalt.err (!%p622_p4)
}
  0x72   : > { %469 = dma.vmem_to_hbm [thread:$0]  (%p1019_p5), %s925_s6, 128, %s923_s28, %s283_s21   ;;  %270 = vst [vmem:[%s244_s24] sm:$0xff] %v267_v6 }
  0x73   : > { %s278_s10 = scalar_lea.sflag [#allocation4], %s898_s23  ;;  %s626_s5 = scalar_lea.vmem %s932_s30, 128 }
  0x74   : > { %p627_p10 = scmp.ne.s32.totalorder %s932_s30, %s626_s5  ;;  %s723_s9 = smov [#allocation7]  }
  0x75   : > { %s630_s11 = sshll.u32 %s723_s9, 4  ;;  %s631_s11 = int_to_ptr.vmem [resolvable:$false] %s630_s11 }
  0x76   : > { %p628_p12 = pnand %p627_p10, %p1019_p5  ;;  %s632_s22 = scalar_lea.vmem %s631_s11, 256 }
  0x77   : > { %p633_p2 = scmp.lt.s32.totalorder %s932_s30, %s631_s11  ;;  %p634_p9 = scmp.lt.s32.totalorder %s632_s22, %s626_s5 }
  0x78   : > { %p629_p1 = pneg %p628_p12 }
  0x79   : > { %p635_p11 = por %p634_p9, %p633_p2 }
  0x7b   : > { %p636_p3 = pnand %p635_p11, %p629_p1 }
  0x7d   : > { %639 = shalt.err (!%p636_p3)
}
  0x7e   : > { %s640_s23 = scalar_lea.hbm %s930_s19, 128  ;;  %s644_s24 = scalar_lea.hbm %s1005_s2, 256 }
  0x7f   : > { %p641_p6 = scmp.ne.s32.totalorder %s930_s19, %s640_s23  ;;  %p645_p0 = scmp.lt.u32.totalorder %s930_s19, %s1005_s2 }
  0x80   : > { %p646_p7 = scmp.lt.u32.totalorder %s644_s24, %s640_s23  ;;  %p648_p10 = scmp.lt.u32.totalorder %s640_s23, %s930_s19 }
  0x81   : > { %p642_p13 = pnand %p641_p6, %p1019_p5 }
  0x82   : > { %p647_p4 = por %p646_p7, %p645_p0 }
  0x83   : > { %p643_p8 = pneg %p642_p13 }
  0x84   : > { %p649_p12 = por %p648_p10, %p647_p4 }
  0x86   : > { %p650_p1 = pnand %p649_p12, %p643_p8 }
  0x88   : > { %653 = shalt.err (!%p650_p1)
}
  0x89   : > { %468 = dma.vmem_to_hbm [thread:$0]  (%p1019_p5), %s932_s30, 128, %s930_s19, %s278_s10  }
  0x8a PF: > { %s321_s4 = sand.u32 1, %s696_s12   ;;  %p1020_p2 = scmp.ne.s32.totalorder %s1012_s27, 0 }
  0x8b   : > { %p1021_p9 = scmp.ge.s32.totalorder %s716_s17, 2  ;;  %s322_s7 = scalar_lea.sflag [#allocation4], %s321_s4 }
  0x8d   : > { %p480_p11 = pnand %p1021_p9, %p1020_p2 }
  0x8f   : > { %687 = dma.done.wait (!%p480_p11), %s322_s7, 128  }
  0x90   : > { %689 = vsyncadd (!%p480_p11), %s322_s7, 4294967168  ;;  %s331_s18 = scalar_lea.sflag [#allocation9], %s321_s4 }
  0x91   : > { %691 = dma.done.wait (!%p480_p11), %s331_s18, 128  }
  0x92   : > { %693 = vsyncadd (!%p480_p11), %s331_s18, 4294967168  ;;  %s26_s17 = sadd.s32 1, %s716_s17   ;;  %s1022_s12 = smov %s700_s13 }
  0x93   : > { %p23_p3 = scmp.ge.s32.totalorder %s26_s17, 4   ;;  %s1023_s13 = smov %s704_s14 }
  0x94   : > { %s1024_s14 = smov %s800_s26  ;;  %s1025_s15 = smov %s712_s16 }
  0x95   : > { %s1026_s16 = smov %s1028_s20  ;;  %25 = sbr.rel (!%p23_p3) target bundleno = 10 (0xa), region = 107 }
  0x9c   :  { %336 = vsyncpa [#allocation3], 1 }
  0x9d   :  { %338 = vsyncpa [#allocation3 + $0x1], 1 }
  0x9e   :  { %339 = vsyncpa [#allocation6], 1 }
  0x9f   :  { %341 = vsyncpa [#allocation6 + $0x1], 1 }
  0xa0   :  { %342 = vsyncpa [#allocation4], 1 }
  0xa1   :  { %344 = vsyncpa [#allocation4 + $0x1], 1 }
  0xa2   :  { %345 = vsyncpa [#allocation9], 1 }
  0xa3   :  { %347 = vsyncpa [#allocation9 + $0x1], 1 }

</bundles_post_ra>
